<compile_context>
chip_gen: v7x
topology: tpu7x:2x2x1
jax: 0.10.0
libtpu: 0.0.40
codegen_flags: <defaults>
</compile_context>

<pallas_src>
import functools

import jax
import jax.numpy as jnp
from jax.experimental import pallas as pl
from jax.experimental.pallas import tpu as pltpu


def _focal_loss_kernel(x_ref, t_ref, a_ref, o_ref, *, gamma, s_valid, tk):
    """One (sample, spatial-tile) block.

    x_ref: (1, C, tk)  logits (any float dtype; upcast in-kernel)
    t_ref: (1, 1, tk)  int32 target class ids
    a_ref: (C, 1)      float32 per-class alpha weights
    o_ref: (1, 1, tk)  float32 per-position focal loss (padded lanes zeroed)
    """
    x = x_ref[0].astype(jnp.float32)                      # (C, tk)
    t = t_ref[0]                                          # (1, tk) int32

    # log_softmax over the class (sublane) axis  (== dim=1 in the module).
    m = jnp.max(x, axis=0, keepdims=True)                 # (1, tk)
    z = x - m
    lse = jnp.log(jnp.sum(jnp.exp(z), axis=0, keepdims=True))
    logp = z - lse                                        # (C, tk)

    # Gather logp / alpha at the target class via a one-hot sublane mask
    # (no dynamic vector gather on TPU).
    cls = jax.lax.broadcasted_iota(jnp.int32, logp.shape, 0)      # (C, tk)
    onehot = cls == t                                             # (C, tk)
    logpt = jnp.sum(jnp.where(onehot, logp, 0.0), axis=0, keepdims=True)   # (1, tk)
    at = jnp.sum(jnp.where(onehot, a_ref[...], 0.0), axis=0, keepdims=True)
    pt = jnp.exp(logpt)
    logpt = logpt * at

    # (1 - pt) ** gamma.  gamma is a Python constant baked into the kernel;
    # integer powers become plain VALU multiplies instead of an EUP pow
    # (log+exp), keeping the single EUP slot free for the softmax exp/log.
    u = 1.0 - pt
    g = float(gamma)
    if g.is_integer() and 0.0 <= g <= 16.0:
        w = jnp.ones_like(u)
        for _ in range(int(g)):
            w = w * u
    else:
        w = u ** g

    loss = -1.0 * w * logpt                               # (1, tk)

    # Zero-out padded spatial lanes so the wrapper can reduce blindly.
    col = pl.program_id(1) * tk + jax.lax.broadcasted_iota(jnp.int32, loss.shape, 1)
    loss = jnp.where(col < s_valid, loss, 0.0)

    o_ref[0] = loss


def focal_loss(logits, target, *, gamma=0.0, alpha=None, size_average=True, tk=1024):
    """logits: (N, C, H, W) (or any (N, C, ...)) or (M, C); target: matching int ids."""
    if logits.ndim > 2:
        n, c = logits.shape[0], logits.shape[1]
        x3 = logits.reshape(n, c, -1)                     # (N, C, S) -- pure reshape
        t2 = target.reshape(n, -1).astype(jnp.int32)      # (N, S)
    else:
        # (M, C) rows-of-samples case: one small transpose, then N=1.
        m_rows, c = logits.shape
        x3 = jnp.transpose(logits, (1, 0)).reshape(1, c, m_rows)
        t2 = target.reshape(1, -1).astype(jnp.int32)
    n, c, s = x3.shape

    # alpha handling identical to the module's __init__.
    if alpha is None:
        alpha_vec = jnp.ones((c,), jnp.float32)
    elif isinstance(alpha, (float, int)):
        alpha_vec = jnp.array([alpha, 1.0 - alpha], jnp.float32)
    else:
        alpha_vec = jnp.asarray(alpha, jnp.float32)
    assert alpha_vec.shape[0] == c, "alpha must provide one weight per class"
    a2d = alpha_vec.reshape(c, 1)

    # Lane tile: multiple of 128, large (big tiles amortize per-step overhead),
    # clamped so tiny spatial extents don't over-pad.  For very large C, shrink
    # tk so the (C, tk) f32 working set stays well inside VMEM.
    tk = max(128, (int(tk) // 128) * 128)
    while c * tk * 4 * 2 > (8 << 20) and tk > 128:        # ~8 MiB double-buffered cap
        tk //= 2
    tk = max(128, (tk // 128) * 128)
    s_pad128 = -(-s // 128) * 128
    tk = min(tk, s_pad128)
    s_pad = -(-s // tk) * tk

    if s_pad != s:
        x3 = jnp.pad(x3, ((0, 0), (0, 0), (0, s_pad - s)))
        t2 = jnp.pad(t2, ((0, 0), (0, s_pad - s)))
    t3 = t2.reshape(n, 1, s_pad)

    grid = (n, s_pad // tk)
    kernel = functools.partial(
        _focal_loss_kernel, gamma=float(gamma), s_valid=s, tk=tk
    )

    # NOTE: no wrapper upcast -- bf16/f16 logits are read at native width and
    # upcast to f32 inside the kernel (halves HBM traffic for bf16 inputs).
    per_pos = pl.pallas_call(
        kernel,
        out_shape=jax.ShapeDtypeStruct((n, 1, s_pad), jnp.float32),
        grid_spec=pltpu.PrefetchScalarGridSpec(
            num_scalar_prefetch=0,
            grid=grid,
            in_specs=[
                pl.BlockSpec((1, c, tk), lambda i, j: (i, 0, j)),
                pl.BlockSpec((1, 1, tk), lambda i, j: (i, 0, j)),
                pl.BlockSpec((c, 1), lambda i, j: (0, 0)),   # grid-invariant, tiny
            ],
            out_specs=pl.BlockSpec((1, 1, tk), lambda i, j: (i, 0, j)),
        ),
        compiler_params=pltpu.CompilerParams(
            dimension_semantics=("parallel", "parallel"),
        ),
    )(x3, t3, a2d)

    total = jnp.sum(per_pos)          # padded lanes were zeroed in-kernel
    if size_average:
        return total / (n * s)        # mean over all N*H*W samples
    # TODO(synk): the PyTorch module returns `loss.sum` (the bound method, a
    # bug); we return the summed value instead.
    return total


if __name__ == "__main__":
    key = jax.random.PRNGKey(0)
    k1, k2 = jax.random.split(key)

    # conv-style logits: batch=2, classes=4, spatial 16x16 (NCHW, like PyTorch)
    N, C, H, W = 2, 4, 16, 16
    logits = jax.random.normal(k1, (N, C, H, W), jnp.float32)
    target = jax.random.randint(k2, (N, H, W), 0, C, jnp.int32)

    # alpha list of length C (module's `isinstance(alpha, list)` branch), gamma=2
    alpha = [0.25, 0.5, 0.75, 1.0]
    gamma = 2.0

    loss = focal_loss(logits, target, gamma=gamma, alpha=alpha, size_average=True)
    jax.block_until_ready(loss)

    # pure-JAX reference (follows the PyTorch view/transpose/view path exactly)
    x2d = jnp.transpose(logits.reshape(N, C, -1), (0, 2, 1)).reshape(-1, C)
    t = target.reshape(-1)
    logp = jax.nn.log_softmax(x2d, axis=-1)
    logpt = jnp.take_along_axis(logp, t[:, None], axis=1)[:, 0]
    pt = jnp.exp(logpt)
    at = jnp.asarray(alpha, jnp.float32)[t]
    ref = jnp.mean(-1.0 * (1.0 - pt) ** gamma * (logpt * at))
    assert jnp.allclose(loss, ref, rtol=1e-5, atol=1e-6), (loss, ref)

    print("KERNEL_OK")
</pallas_src>

<mosaic_0001>
module attributes {stable_mosaic.version = 11 : i64} {
  func.func @_focal_loss_kernel(%arg0: i32, %arg1: i32, %arg2: memref<1x4x256xf32, #tpu.memory_space<vmem>>, %arg3: memref<1x1x256xi32, #tpu.memory_space<vmem>>, %arg4: memref<4x1xf32, #tpu.memory_space<vmem>>, %arg5: memref<1x1x256xf32, #tpu.memory_space<vmem>>) attributes {dimension_semantics = [#tpu.dimension_semantics<parallel>, #tpu.dimension_semantics<parallel>], iteration_bounds = array<i64: 2, 1>, scalar_prefetch = 0 : i64, scratch_operands = 0 : i64, tpu.core_type = #tpu.core_type<tc>, window_params = [{transform_indices = @transform_0, window_bounds = array<i64: 1, 4, 256>}, {transform_indices = @transform_1, window_bounds = array<i64: 1, 1, 256>}, {pipeline_mode = #tpu.pipeline_mode<synchronous>, transform_indices = @transform_2, window_bounds = array<i64: 4, 1>}, {transform_indices = @transform_3, window_bounds = array<i64: 1, 1, 256>}]} {
    %c0 = arith.constant 0 : index
    %c0_0 = arith.constant 0 : index
    %c0_1 = arith.constant 0 : index
    %0 = vector.load %arg2[%c0, %c0_0, %c0_1] : memref<1x4x256xf32, #tpu.memory_space<vmem>>, vector<1x4x256xf32>
    %1 = vector.shape_cast %0 : vector<1x4x256xf32> to vector<4x256xf32>
    %c0_2 = arith.constant 0 : index
    %c0_3 = arith.constant 0 : index
    %c0_4 = arith.constant 0 : index
    %2 = vector.load %arg3[%c0_2, %c0_3, %c0_4] : memref<1x1x256xi32, #tpu.memory_space<vmem>>, vector<1x1x256xi32>
    %3 = vector.shape_cast %2 : vector<1x1x256xi32> to vector<1x256xi32>
    %cst = arith.constant dense<0xFF800000> : vector<256xf32>
    %4 = vector.multi_reduction <maximumf>, %1, %cst [0] : vector<4x256xf32> to vector<256xf32>
    %5 = vector.shape_cast %4 : vector<256xf32> to vector<1x256xf32>
    %6 = vector.broadcast %5 : vector<1x256xf32> to vector<4x256xf32>
    %7 = arith.subf %1, %6 : vector<4x256xf32>
    %8 = math.exp %7 : vector<4x256xf32>
    %cst_5 = arith.constant dense<0.000000e+00> : vector<256xf32>
    %9 = vector.multi_reduction <add>, %8, %cst_5 [0] : vector<4x256xf32> to vector<256xf32>
    %10 = vector.shape_cast %9 : vector<256xf32> to vector<1x256xf32>
    %11 = math.log %10 : vector<1x256xf32>
    %12 = vector.broadcast %11 : vector<1x256xf32> to vector<4x256xf32>
    %13 = arith.subf %7, %12 : vector<4x256xf32>
    %14 = tpu.iota {dimensions = array<i32: 0>} : vector<4x256xi32>
    %15 = vector.broadcast %3 : vector<1x256xi32> to vector<4x256xi32>
    %16 = arith.cmpi eq, %14, %15 : vector<4x256xi32>
    %cst_6 = arith.constant 0.000000e+00 : f32
    %17 = vector.broadcast %cst_6 : f32 to vector<4x256xf32>
    %18 = arith.select %16, %13, %17 : vector<4x256xi1>, vector<4x256xf32>
    %cst_7 = arith.constant dense<0.000000e+00> : vector<256xf32>
    %19 = vector.multi_reduction <add>, %18, %cst_7 [0] : vector<4x256xf32> to vector<256xf32>
    %20 = vector.shape_cast %19 : vector<256xf32> to vector<1x256xf32>
    %c0_8 = arith.constant 0 : index
    %c0_9 = arith.constant 0 : index
    %21 = vector.load %arg4[%c0_8, %c0_9] : memref<4x1xf32, #tpu.memory_space<vmem>>, vector<4x1xf32>
    %cst_10 = arith.constant 0.000000e+00 : f32
    %22 = vector.shape_cast %21 : vector<4x1xf32> to vector<4x1xf32>
    %23 = vector.broadcast %22 : vector<4x1xf32> to vector<4x256xf32>
    %24 = vector.broadcast %cst_10 : f32 to vector<4x256xf32>
    %25 = arith.select %16, %23, %24 : vector<4x256xi1>, vector<4x256xf32>
    %cst_11 = arith.constant dense<0.000000e+00> : vector<256xf32>
    %26 = vector.multi_reduction <add>, %25, %cst_11 [0] : vector<4x256xf32> to vector<256xf32>
    %27 = vector.shape_cast %26 : vector<256xf32> to vector<1x256xf32>
    %28 = math.exp %20 : vector<1x256xf32>
    %29 = arith.mulf %20, %27 : vector<1x256xf32>
    %cst_12 = arith.constant 1.000000e+00 : f32
    %30 = vector.broadcast %cst_12 : f32 to vector<1x256xf32>
    %31 = arith.subf %30, %28 : vector<1x256xf32>
    %cst_13 = arith.constant 1.000000e+00 : f32
    %32 = vector.broadcast %cst_13 : f32 to vector<1x256xf32>
    %33 = arith.mulf %32, %31 : vector<1x256xf32>
    %34 = arith.mulf %33, %31 : vector<1x256xf32>
    %cst_14 = arith.constant -1.000000e+00 : f32
    %35 = vector.broadcast %cst_14 : f32 to vector<1x256xf32>
    %36 = arith.mulf %35, %34 : vector<1x256xf32>
    %37 = arith.mulf %36, %29 : vector<1x256xf32>
    %c256_i32 = arith.constant 256 : i32
    %38 = arith.muli %arg1, %c256_i32 : i32
    %39 = tpu.iota {dimensions = array<i32: 1>} : vector<1x256xi32>
    %40 = vector.broadcast %38 : i32 to vector<1x256xi32>
    %41 = arith.addi %40, %39 : vector<1x256xi32>
    %c256_i32_15 = arith.constant 256 : i32
    %42 = vector.broadcast %c256_i32_15 : i32 to vector<1x256xi32>
    %43 = arith.cmpi slt, %41, %42 : vector<1x256xi32>
    %cst_16 = arith.constant 0.000000e+00 : f32
    %44 = vector.broadcast %cst_16 : f32 to vector<1x256xf32>
    %45 = arith.select %43, %37, %44 : vector<1x256xi1>, vector<1x256xf32>
    %c0_17 = arith.constant 0 : index
    %c0_18 = arith.constant 0 : index
    %c0_19 = arith.constant 0 : index
    %46 = vector.load %arg5[%c0_17, %c0_18, %c0_19] : memref<1x1x256xf32, #tpu.memory_space<vmem>>, vector<1x1x256xf32>
    %47 = vector.shape_cast %46 : vector<1x1x256xf32> to vector<1x256xf32>
    %48 = vector.shape_cast %45 : vector<1x256xf32> to vector<1x1x256xf32>
    tpu.vector_store %arg5[%c0_17, %c0_18, %c0_19], %48 {strides = array<i32>} : memref<1x1x256xf32, #tpu.memory_space<vmem>>, vector<1x1x256xf32>,
    return
  }
  func.func @transform_0(%arg0: i32, %arg1: i32) -> (i32, i32, i32) {
    %c0_i32 = arith.constant 0 : i32
    %c0_i32_0 = arith.constant 0 : i32
    return %arg0, %c0_i32, %arg1 : i32, i32, i32
  }
  func.func @transform_1(%arg0: i32, %arg1: i32) -> (i32, i32, i32) {
    %c0_i32 = arith.constant 0 : i32
    %c0_i32_0 = arith.constant 0 : i32
    return %arg0, %c0_i32, %arg1 : i32, i32, i32
  }
  func.func @transform_2(%arg0: i32, %arg1: i32) -> (i32, i32) {
    %c0_i32 = arith.constant 0 : i32
    %c0_i32_0 = arith.constant 0 : i32
    %c0_i32_1 = arith.constant 0 : i32
    return %c0_i32, %c0_i32_0 : i32, i32
  }
  func.func @transform_3(%arg0: i32, %arg1: i32) -> (i32, i32, i32) {
    %c0_i32 = arith.constant 0 : i32
    %c0_i32_0 = arith.constant 0 : i32
    return %arg0, %c0_i32, %arg1 : i32, i32, i32
  }
}

</mosaic_0001>

<bundles_post_ra>
// kernel: tpu_custom_call.1
= control target key start
LH: loop header
LB: loop body
LE: loop exit
PB: predicated region body
PF: predicated region fallthrough
CT: control target
= control target key end

     0   :  { %8 = vsyncpa [#allocation3], 0  ;;  %s948_s0 = inlined_call_operand.hbm [shape: f32[2,4,256], index: 0, kind: input, shape index: {}]   ;;  %s949_s1 = inlined_call_operand.vmem [shape: s32[2,1,256], index: 1, kind: input, shape index: {}]   ;;  %s950_s2 = inlined_call_operand.vmem [shape: f32[4,1], index: 2, kind: input, shape index: {}]   ;;  %s951_s3 = inlined_call_operand.hbm [shape: f32[2,1,256], index: 3, kind: output, shape index: {}]  }
   0x1   :  { %10 = vsyncpa [#allocation3 + $0x1], 0 }
   0x2   :  { %11 = vsyncpa [#allocation4], 0 }
   0x3   :  { %13 = vsyncpa [#allocation4 + $0x1], 0  ;;  %s742_s12 = smov 0   ;;  %s744_s13 = smov 0  }
   0x4   :  { %s746_s14 = smov 0   ;;  %s748_s15 = smov 0  }
   0x5   :  { %s750_s16 = smov 0   ;;  %s752_s17 = smov 0  }
   0x6 LB: > { %s510_s18 = sadd.s32 4294967295, %s716_s17   ;;  %s511_s19 = sadd.s32 4294967294, %s716_s17   ;;  %s716_s17 = sphi %s752_s17, %s19_s17   ;;  %s712_s16 = sphi %s750_s16, %s967_s16   ;;  %s708_s15 = sphi %s748_s15, %s966_s15   ;;  %s704_s14 = sphi %s746_s14, %s965_s14   ;;  %s700_s13 = sphi %s744_s13, %s964_s13   ;;  %s696_s12 = sphi %s742_s12, %s963_s12  }
   0x7   : > { %s31_s20 = sadd.s32 1, %s712_s16  ;;  %s40_s21 = sadd.s32 1, %s704_s14 }
   0x8   : > { %p33_p0 = scmp.ge.s32.totalorder %s31_s20, 2  ;;  %p47_p1 = scmp.ne.s32.totalorder %s704_s14, %s700_s13 }
   0x9   : > { %p48_p2 = scmp.eq.s32.totalorder %s716_s17, 0  ;;  %p53_p3 = scmp.ne.s32.totalorder %s700_s13, %s696_s12 }
   0xa   : > { %s969_s20 = smov (%p33_p0, %s31_s20), 0  ;;  %p54_p5 = scmp.eq.s32.totalorder %s510_s18, 0 }
   0xb   : > { %p783_p4 = por %p48_p2, %p47_p1  ;;  %s35_s23 = ssub.s32 %s712_s16, %s969_s20 }
   0xc   : > { %p128_p6 = scmp.eq.s32.totalorder %s510_s18, 1  ;;  %p38_p7 = scmp.eq.s32.totalorder %s35_s23, 0 }
   0xd   : > { %p789_p8 = por %p54_p5, %p53_p3  ;;  %p134_p10 = scmp.eq.s32.totalorder %s511_s19, 1 }
   0xe   : > { %p793_p9 = por %p128_p6, %p47_p1  ;;  %p540_p13 = scmp.lt.s32.totalorder %s716_s17, 2 }
   0xf   : > { %s798_s26 = scalar_select %p38_p7, %s704_s14, %s40_s21  }
  0x10   : > { %s955_s25 = scalar_select %p793_p9, 1, 0 }
  0x11   : > { %p800_p11 = por %p134_p10, %p53_p3  ;;  %s157_s28 = sand.u32 1, %s704_s14  }
  0x12   : > { %s514_s29 = sshll.u32 %s157_s28, 3  ;;  %s526_s30 = sshll.u32 %s712_s16, 7 }
  0x13   : > { %s956_s27 = scalar_select %p800_p11, 1, 0 }
  0x14   : > { %s811_s6 = scalar_lea.hbm %s948_s0, %s526_s30  ;;  %s161_s7 = scalar_lea.vmem [#allocation2], %s514_s29 }
  0x15   : > { %s171_s8 = sshll.u32 %s161_s7, 4  ;;  %p817_p0 = pnand %p540_p13, %p783_p4  ;;  %s813_s8 = int_to_ptr.vmem [resolvable:$true] %s171_s8 }
  0x16   : > { %s158_s10 = scalar_lea.sflag [#allocation3], %s157_s28  ;;  %s604_s11 = scalar_lea.hbm %s811_s6, 128 }
  0x17   : > { %p605_p3 = scmp.ne.s32.totalorder %s811_s6, %s604_s11  ;;  %p606_p5 = pneg %p817_p0 }
  0x18   : > { %s609_s21 = scalar_lea.hbm %s948_s0, 256  ;;  %p610_p4 = scmp.lt.u32.totalorder %s811_s6, %s948_s0 }
  0x19   : > { %p607_p6 = pnand %p606_p5, %p605_p3  ;;  %p611_p10 = scmp.lt.u32.totalorder %s609_s21, %s604_s11 }
  0x1a   : > { %p613_p12 = scmp.lt.u32.totalorder %s604_s11, %s811_s6 }
  0x1b   : > { %p608_p7 = pneg %p607_p6  ;;  %p612_p13 = por %p611_p10, %p610_p4 }
  0x1d   : > { %p614_p1 = por %p613_p12, %p612_p13 }
  0x1f   : > { %p615_p2 = pnand %p614_p1, %p608_p7 }
  0x21   : > { %618 = shalt.err (!%p615_p2)
}
  0x22   : > { %s619_s28 = scalar_lea.vmem %s813_s8, 128  ;;  %s718_s29 = smov [#allocation2]  }
  0x23   : > { %p620_p3 = scmp.ne.s32.totalorder %s813_s8, %s619_s28  ;;  %s624_s30 = sshll.u32 %s718_s29, 4  ;;  %s625_s30 = int_to_ptr.vmem [resolvable:$false] %s624_s30 }
  0x24   : > { %s626_s4 = scalar_lea.vmem %s625_s30, 256  ;;  %p627_p9 = scmp.lt.s32.totalorder %s813_s8, %s625_s30 }
  0x25   : > { %p622_p6 = pnand %p620_p3, %p606_p5  ;;  %p628_p4 = scmp.lt.s32.totalorder %s626_s4, %s619_s28 }
  0x27   : > { %p623_p11 = pneg %p622_p6  ;;  %p629_p10 = por %p628_p4, %p627_p9 }
  0x29   : > { %p630_p12 = pnand %p629_p10, %p623_p11 }
  0x2b   : > { %633 = shalt.err (!%p630_p12)
}
  0x2c   : > { %535 = dma.hbm_to_vmem [thread:$0]  (!%p817_p0), %s811_s6, 128, %s813_s8, %s158_s10  }
  0x2d   : > { %p958_p1 = scmp.lt.s32.totalorder %s716_s17, 3  ;;  %p959_p2 = scmp.ge.s32.totalorder %s716_s17, 1 }
  0x2f   : > { %p189_p5 = pnand %p959_p2, %p958_p1 }
  0x30   : > { %s853_s5 = sand.u32 (!%p189_p5), 1, %s700_s13  }
  0x31   : > { %192 = sbr.rel (%p189_p5) target bundleno = 225 (0xe1), region = 32  ;;  %s518_s7 = sshll.u32 (!%p189_p5), %s853_s5, 3 }
  0x32   : > { %s195_s11 = scalar_lea.sflag (!%p189_p5), [#allocation3], %s853_s5  ;;  %s198_s18 = scalar_lea.vmem (!%p189_p5), [#allocation2], %s518_s7 }
  0x38   : > { %687 = dma.done.wait (%p789_p8), %s195_s11, 128  }
  0x39   : > { %689 = vsyncadd (%p789_p8), %s195_s11, 4294967168  ;;  %v719_v0 = vmov 0   ;;  %vm245_vm0 = vcmask 1043456   ;;  %v324_v1 = vld [vmem:[%s950_s2] sm:$0xf]  ;;  %p231_p8 = scmp.lt.s32.totalorder %s708_s15, 1  ;;  %v293_v38 = vlaneseq }
  0x3a   : > { %592 = vset.pattern.permute.xlu0 %v719_v0  ;;  %v240_v2 = vld [vmem:[%s198_s18] sm:$0xff]  ;;  %s519_s22 = sshll.u32 %s853_s5, 1  ;;  %s527_s23 = sshll.u32 %s708_s15, 5 }
  0x3b   : > { %327 = vperm.xlu0 %592, %v324_v1   ;;  %v243_v3 = vcombine.high %v240_v2, %v240_v2  ;;  %v246_v4 = vsel %vm245_vm0, %v240_v2, -inf  ;;  %s232_s24 = scalar_select %p231_p8, %s708_s15, 1  ;;  %v871_v40 = vshrl.u32 %v293_v38, 7  ;;  %vm391_vm3 = vcmp.lt.s32.totalorder %v293_v38, 256 }
  0x3c   : > { %v247_v5 = vrot.slane %v246_v4, 4  ;;  %s228_s28 = scalar_lea.vmem [#allocation5], %s519_s22  ;;  %s899_s7 = scalar_lea.hbm %s951_s3, %s527_s23 }
  0x3d   : > { %v253_v6 = vsel %vm245_vm0, %v243_v3, -inf  ;;  %s520_s9 = sshll.u32 %s232_s24, 1  ;;  %v297_v43 = vsub.s32 0, %v871_v40  ;;  %v301_v45 = vsub.s32 1, %v871_v40  ;;  %s411_s29 = sshll.u32 %s228_s28, 4  ;;  %s901_s29 = int_to_ptr.vmem [resolvable:$true] %s411_s29 }
  0x3e   : > { %v248_v7 = vmax.f32 %v246_v4, %v247_v5  ;;  %v254_v8 = vrot.slane %v253_v6, 4  ;;  %s237_s21 = scalar_lea.vmem %s949_s1, %s520_s9  ;;  %s395_s11 = scalar_lea.sflag [#allocation4], %s853_s5 }
  0x3f   : > { %v241_v46 = vld [vmem:[%s237_s21] sm:$0x3]  ;;  %s634_s18 = scalar_lea.vmem %s901_s29, 32  ;;  %p960_p11 = scmp.ne.s32.totalorder %s955_s25, 0 }
  0x40   : > { %v249_v9 = vrot.slane %v248_v7, 2  ;;  %v255_v10 = vmax.f32 %v253_v6, %v254_v8  ;;  %v298_v48 = vrot.slane %v241_v46, %v297_v43  ;;  %v302_v49 = vrot.slane %v241_v46, %v301_v45  ;;  %p635_p9 = scmp.ne.s32.totalorder %s901_s29, %s634_s18  ;;  %s721_s15 = smov [#allocation5]  }
  0x41   : > { %s638_s6 = sshll.u32 %s721_s15, 4  ;;  %s639_s6 = int_to_ptr.vmem [resolvable:$false] %s638_s6 }
  0x42   : > { %v250_v11 = vmax.f32 %v248_v7, %v249_v9  ;;  %v256_v12 = vrot.slane %v255_v10, 2  ;;  %vm303_vm1 = vcmp.eq.s32.totalorder %v871_v40, %v298_v48  ;;  %vm304_vm2 = vcmp.eq.s32.totalorder %v871_v40, %v302_v49  ;;  %p636_p0 = pnand %p635_p9, %p960_p11  ;;  %s640_s8 = scalar_lea.vmem %s639_s6, 64 }
  0x43   : > { %p641_p13 = scmp.lt.s32.totalorder %s901_s29, %s639_s6  ;;  %p642_p3 = scmp.lt.s32.totalorder %s640_s8, %s634_s18 }
  0x44   : > { %v251_v13 = vrot.slane %v250_v11, 1  ;;  %v257_v14 = vmax.f32 %v255_v10, %v256_v12  ;;  %p637_p7 = pneg %p636_p0 }
  0x45   : > { %p643_p6 = por %p642_p3, %p641_p13 }
  0x46   : > { %v252_v15 = vmax.f32 %v250_v11, %v251_v13  ;;  %v258_v16 = vrot.slane %v257_v14, 1 }
  0x47   : > { %p644_p4 = pnand %p643_p6, %p637_p7 }
  0x48   : > { %v259_v17 = vmax.f32 %v257_v14, %v258_v16 }
  0x4a   : > { %v262_v18 = vcombine.low %v252_v15, %v259_v17 }
  0x4c   : > { %v264_v19 = vsub.f32 %v240_v2, %v262_v18 }
  0x4e   : > { %v265_v20 = vmul.f32 1.442695, %v264_v19 }
  0x50   : > { %594 = vpow2.f32 %v265_v20  ;;  %v720_v20 = vmov 1966171168  }
  0x5a   : > { %v595_v21 = vpop.eup %594 }
  0x5b   : > { %v268_v22 = vcombine.high %v595_v21, %v595_v21  ;;  %v270_v23 = vsel %vm245_vm0, %v595_v21, 0.0  ;;  %v375_v21 = vunpack.c.l.s4 %v720_v20 }
  0x5c   : > { %v271_v24 = vrot.slane %v270_v23, 4 }
  0x5d   : > { %v277_v25 = vsel %vm245_vm0, %v268_v22, 0.0 }
  0x5e   : > { %v272_v26 = vadd.f32 %v271_v24, %v270_v23  ;;  %v278_v27 = vrot.slane %v277_v25, 4 }
  0x60   : > { %v279_v28 = vadd.f32 %v278_v27, %v277_v25  ;;  %v273_v29 = vrot.slane %v272_v26, 2 }
  0x62   : > { %v280_v30 = vrot.slane %v279_v28, 2  ;;  %v274_v31 = vadd.f32 %v273_v29, %v272_v26 }
  0x64   : > { %v281_v32 = vadd.f32 %v280_v30, %v279_v28  ;;  %v275_v33 = vrot.slane %v274_v31, 1  ;;  %v376_v28 = vunpack.c.0.s8 %v375_v21 }
  0x66   : > { %v282_v34 = vrot.slane %v281_v32, 1  ;;  %v276_v35 = vadd.f32 %v275_v33, %v274_v31 }
  0x68   : > { %v283_v36 = vadd.f32 %v282_v34, %v281_v32  ;;  %596 = vlog2.f32 %v276_v35  ;;  %v379_v35 = vsub.s32 %v376_v28, %v871_v40 }
  0x6a   : > { %598 = vlog2.f32 %v283_v36 }
  0x72   : > { %v597_v37 = vpop.eup %596 }
  0x73   : > { %v285_v41 = vmul.f32 0.6931472, %v597_v37 }
  0x74   : > { %v599_v39 = vpop.eup %598 }
  0x75   : > { %v287_v42 = vmul.f32 0.6931472, %v599_v39 }
  0x77   : > { %v290_v44 = vcombine.low %v285_v41, %v287_v42 }
  0x79   : > { %v292_v47 = vsub.f32 %v264_v19, %v290_v44 }
  0x7b   : > { %v306_v50 = vcombine.high %v292_v47, %v292_v47  ;;  %v308_v51 = vsel %vm303_vm1, %v292_v47, 0.0 }
  0x7c   : > { %v310_v53 = vsel %vm245_vm0, %v308_v51, 0.0 }
  0x7d   : > { %v309_v52 = vsel %vm304_vm2, %v306_v50, 0.0  ;;  %v311_v55 = vrot.slane %v310_v53, 4 }
  0x7e   : > { %v317_v54 = vsel %vm245_vm0, %v309_v52, 0.0 }
  0x7f   : > { %v318_v56 = vrot.slane %v317_v54, 4  ;;  %v312_v57 = vadd.f32 %v311_v55, %v310_v53 }
  0x81   : > { %v319_v58 = vadd.f32 %v318_v56, %v317_v54  ;;  %v313_v59 = vrot.slane %v312_v57, 2 }
  0x83   : > { %v320_v60 = vrot.slane %v319_v58, 2  ;;  %v314_v61 = vadd.f32 %v313_v59, %v312_v57 }
  0x85   : > { %v321_v62 = vadd.f32 %v320_v60, %v319_v58  ;;  %v315_v63 = vrot.slane %v314_v61, 1 }
  0x87   : > { %v322_v0 = vrot.slane %v321_v62, 1  ;;  %v316_v1 = vadd.f32 %v315_v63, %v314_v61 }
  0x89   : > { %v323_v2 = vadd.f32 %v322_v0, %v321_v62  ;;  %v346_v3 = vmul.f32 1.442695, %v316_v1 }
  0x8b   : > { %v348_v4 = vmul.f32 1.442695, %v323_v2  ;;  %600 = vpow2.f32 %v346_v3 }
  0x8d   : > { %602 = vpow2.f32 %v348_v4 }
  0x95   : > { %v601_v6 = vpop.eup %600 }
  0x96   : > { %v352_v16 = vsub.f32 1.0, %v601_v6 }
  0x97   : > { %v603_v9 = vpop.eup %602 }
  0x98   : > { %v353_v17 = vsub.f32 1.0, %v603_v9  ;;  %v354_v24 = vmul.f32 %v352_v16, %v352_v16 }
  0x9a   : > { %v355_v25 = vmul.f32 %v353_v17, %v353_v17  ;;  %v356_v31 = vmul.f32 -1.0, %v354_v24 }
  0x9c   : > { %v357_v32 = vmul.f32 -1.0, %v355_v25 }
  0xba   : > { %v328_v5 = vpop.permute.xlu0 %327 }
  0xbb   : > { %v330_v7 = vsel %vm303_vm1, %v328_v5, 0.0  ;;  %v331_v8 = vsel %vm304_vm2, %v328_v5, 0.0 }
  0xbc   : > { %v332_v10 = vsel %vm245_vm0, %v330_v7, 0.0  ;;  %v339_v11 = vsel %vm245_vm0, %v331_v8, 0.0 }
  0xbd   : > { %v333_v12 = vrot.slane %v332_v10, 4  ;;  %v340_v13 = vrot.slane %v339_v11, 4 }
  0xbf   : > { %v334_v14 = vadd.f32 %v333_v12, %v332_v10  ;;  %v341_v15 = vadd.f32 %v340_v13, %v339_v11 }
  0xc1   : > { %v335_v18 = vrot.slane %v334_v14, 2  ;;  %v342_v19 = vrot.slane %v341_v15, 2 }
  0xc3   : > { %v336_v22 = vadd.f32 %v335_v18, %v334_v14  ;;  %v343_v23 = vadd.f32 %v342_v19, %v341_v15 }
  0xc5   : > { %v337_v26 = vrot.slane %v336_v22, 1  ;;  %v344_v27 = vrot.slane %v343_v23, 1 }
  0xc7   : > { %v338_v29 = vadd.f32 %v337_v26, %v336_v22  ;;  %v345_v30 = vadd.f32 %v344_v27, %v343_v23 }
  0xc9   : > { %v350_v33 = vmul.f32 %v338_v29, %v316_v1  ;;  %v351_v34 = vmul.f32 %v345_v30, %v323_v2 }
  0xcb   : > { %v358_v36 = vmul.f32 %v356_v31, %v350_v33  ;;  %v359_v37 = vmul.f32 %v357_v32, %v351_v34 }
  0xcd   : > { %v373_v39 = vcombine.low %v358_v36, %v359_v37 }
  0xcf   : > { %v380_v41 = vrot.slane %v373_v39, %v379_v35 }
  0xd1   : > { %v387_v42 = vrot.slane %v380_v41, %v379_v35 }
  0xd3   : > { %393 = vst.msk [vmem:[%s228_s28] sm:$0x3] %vm391_vm3, %v387_v42 }
  0xd4   : > { %647 = shalt.err (!%p644_p4)
}
  0xd5   : > { %s648_s5 = scalar_lea.hbm %s899_s7, 32  ;;  %s652_s10 = scalar_lea.hbm %s951_s3, 64 }
  0xd6   : > { %p649_p10 = scmp.ne.s32.totalorder %s899_s7, %s648_s5  ;;  %p653_p2 = scmp.lt.u32.totalorder %s899_s7, %s951_s3 }
  0xd7   : > { %p654_p5 = scmp.lt.u32.totalorder %s652_s10, %s648_s5  ;;  %p656_p9 = scmp.lt.u32.totalorder %s648_s5, %s899_s7 }
  0xd8   : > { %p650_p12 = pnand %p649_p10, %p960_p11 }
  0xd9   : > { %p655_p8 = por %p654_p5, %p653_p2 }
  0xda   : > { %p651_p1 = pneg %p650_p12 }
  0xdb   : > { %p657_p0 = por %p656_p9, %p655_p8 }
  0xdd   : > { %p658_p7 = pnand %p657_p0, %p651_p1 }
  0xdf   : > { %661 = shalt.err (!%p658_p7)
}
  0xe0   : > { %530 = dma.vmem_to_hbm [thread:$0]  (%p960_p11), %s901_s29, 32, %s899_s7, %s395_s11  }
  0xe1 PF: > { %s423_s22 = sand.u32 1, %s696_s12   ;;  %p961_p13 = scmp.ne.s32.totalorder %s956_s27, 0 }
  0xe2   : > { %p962_p3 = scmp.ge.s32.totalorder %s716_s17, 2  ;;  %s424_s23 = scalar_lea.sflag [#allocation4], %s423_s22 }
  0xe4   : > { %p537_p6 = pnand %p962_p3, %p961_p13 }
  0xe6   : > { %691 = dma.done.wait (!%p537_p6), %s424_s23, 32  }
  0xe7   : > { %693 = vsyncadd (!%p537_p6), %s424_s23, 4294967264  ;;  %s19_s17 = sadd.s32 1, %s716_s17   ;;  %s963_s12 = smov %s700_s13 }
  0xe8   : > { %p16_p4 = scmp.ge.s32.totalorder %s19_s17, 4   ;;  %s964_s13 = smov %s704_s14 }
  0xe9   : > { %s965_s14 = smov %s798_s26  ;;  %s966_s15 = smov %s712_s16 }
  0xea   : > { %s967_s16 = smov %s969_s20  ;;  %18 = sbr.rel (!%p16_p4) target bundleno = 6 (0x6), region = 80 }
  0xf1   :  { %429 = vsyncpa [#allocation3], 1 }
  0xf2   :  { %431 = vsyncpa [#allocation3 + $0x1], 1 }
  0xf3   :  { %432 = vsyncpa [#allocation4], 1 }
  0xf4   :  { %434 = vsyncpa [#allocation4 + $0x1], 1 }

</bundles_post_ra>
